<compile_context>
chip_gen: v5e
topology: v5e:2x2
jax: 0.10.0
libtpu: 0.0.40
codegen_flags: <defaults>
</compile_context>

<pallas_src>
import functools

import jax
import jax.numpy as jnp
from jax import lax
from jax.experimental import pallas as pl
from jax.experimental.pallas import tpu as pltpu


def _round_up(a: int, b: int) -> int:
    return ((a + b - 1) // b) * b


@functools.lru_cache(maxsize=None)
def _vmem_limit_bytes() -> int:
    """Generation-aware VMEM limit: ~75% of physical VMEM (96 MiB v5e/v6e, 48 MiB v7x)."""
    cap = None
    try:
        cap = int(pltpu.get_tpu_info().vmem_capacity_bytes)
    except Exception:  # non-TPU / API mismatch -> conservative fallback
        cap = None
    if not cap or cap <= 0:
        cap = 64 * 1024 * 1024  # conservative: fits v7x's 64 MiB physical VMEM
    return cap * 3 // 4


def _fits(tm: int, th: int, n_hidden_steps: int, dim_p: int,
          dsize: int, out_dsize: int, budget: int) -> bool:
    """Estimated VMEM footprint of one kernel instance (double-buffered tiles)."""
    xb = 2 * tm * dim_p * dsize                    # input row tile
    ob = 2 * tm * dim_p * out_dsize                # output row tile
    wb = 2 * (dim_p * th + th * dim_p) * dsize     # w1 + w2 tiles
    bb = 2 * (th + dim_p) * dsize                  # biases
    hb = 2 * tm * th * 4                           # f32 GELU intermediate (slack)
    ab = tm * dim_p * 4 if n_hidden_steps > 1 else 0   # f32 accumulator scratch
    return xb + ob + wb + bb + hb + ab <= budget


def _select_tiles(n_rows: int, dim_p: int, hidden: int,
                  dsize: int, out_dsize: int, budget: int):
    """Pick (tm, th, hidden_p). th == hidden_p means weights fully VMEM-resident."""
    # Cap the row tile so there are >= 2 row tiles when possible (v7x megacore),
    # and at 1024 (weight-streaming amortization target for v6e).
    tm_cap = n_rows if n_rows <= 8 else _round_up(-(-n_rows // 2), 8)
    tm_cap = min(tm_cap, 1024)
    tm_cands = sorted(
        {t for t in (tm_cap, 1024, 768, 512, 384, 256, 192, 128, 96, 64, 32, 16, 8)
         if 0 < t <= tm_cap},
        reverse=True)

    hidden_al = _round_up(hidden, 128)
    th_cands = [hidden_al] + [t for t in (2048, 1024, 512, 256, 128) if t < hidden_al]

    best = None
    for th in th_cands:
        hidden_p = _round_up(hidden, th)
        n_h = hidden_p // th
        # Resident weights stay efficient with smaller row tiles; chunked weights want
        # a bigger row tile to amortize re-streaming.
        floor = min(128 if n_h == 1 else 256, tm_cap)
        for tm in tm_cands:
            if _fits(tm, th, n_h, dim_p, dsize, out_dsize, budget):
                if tm >= floor:
                    return tm, th, hidden_p
                if best is None:
                    best = (tm, th, hidden_p)
                break
    if best is not None:
        return best
    # Last resort: smallest sane tiles (hard VMEM limit is enforced separately).
    return min(8, tm_cap), 128, _round_up(hidden, 128)


def _gelu(h, approximate: bool):
    if approximate:
        # Opt-in tanh approximation (EUP-routed); differs slightly from PyTorch's
        # default exact GELU.
        return jax.nn.gelu(h, approximate=True)
    return 0.5 * h * (1.0 + lax.erf(h * 0.7071067811865476))


def _ffn_kernel_resident(approximate, x_ref, w1_ref, b1_ref, w2_ref, b2_ref, o_ref):
    # Weights fully resident in VMEM (grid-invariant blocks); single hidden step.
    h = jnp.dot(x_ref[...], w1_ref[...], preferred_element_type=jnp.float32)
    h = _gelu(h + b1_ref[...], approximate)
    # Dropout(p) is identity at inference / p=0.0.
    # TODO(synk): training-mode dropout (pltpu.prng_* + mask) not implemented.
    out = jnp.dot(h.astype(w2_ref.dtype), w2_ref[...], preferred_element_type=jnp.float32)
    o_ref[...] = (out + b2_ref[...]).astype(o_ref.dtype)


def _ffn_kernel_chunked(approximate, x_ref, w1_ref, b1_ref, w2_ref, b2_ref, o_ref, acc_ref):
    # Hidden axis split into chunks; f32 accumulator resident across the hidden axis.
    j = pl.program_id(1)

    @pl.when(j == 0)
    def _():
        acc_ref[...] = jnp.zeros_like(acc_ref)

    h = jnp.dot(x_ref[...], w1_ref[...], preferred_element_type=jnp.float32)
    h = _gelu(h + b1_ref[...], approximate)
    # Dropout(p) is identity at inference / p=0.0.
    acc_ref[...] += jnp.dot(h.astype(w2_ref.dtype), w2_ref[...],
                            preferred_element_type=jnp.float32)

    @pl.when(j == pl.num_programs(1) - 1)
    def _():
        o_ref[...] = (acc_ref[...] + b2_ref[...]).astype(o_ref.dtype)


@functools.partial(jax.jit, static_argnames=("gelu_approximate", "vmem_budget_bytes"))
def feed_forward(x, w1, b1, w2, b2, *, gelu_approximate=False, vmem_budget_bytes=None):
    """FeedForward: Linear(dim->hidden) -> GELU -> Dropout -> Linear(hidden->dim) -> Dropout.

    x: (B, S, dim). Weights pre-transposed to (in, out): w1 (dim, hidden), w2 (hidden, dim).
    Biases may be 1-D (PyTorch style) or (1, n). Dropout is identity (inference / p=0.0).
    """
    B, S, dim = x.shape
    hidden = w1.shape[1]
    N = B * S

    b1 = b1.reshape(1, hidden)
    b2 = b2.reshape(1, dim)

    dsize = jnp.dtype(x.dtype).itemsize
    out_dsize = dsize

    vmem_limit = _vmem_limit_bytes()
    budget = int(vmem_limit * 0.9) if vmem_budget_bytes is None else int(vmem_budget_bytes)

    dim_p = _round_up(dim, 128)
    n_rows = _round_up(N, 8)
    tm, th, hidden_p = _select_tiles(n_rows, dim_p, hidden, dsize, out_dsize, budget)
    n_p = _round_up(N, tm)
    n_h = hidden_p // th
    grid_i = n_p // tm

    # Zero-padding keeps the math exact: padded input features hit zero weight rows,
    # padded hidden units produce GELU(0)=0 against zero w2 rows, padded output
    # features/rows are sliced off below. Pads are skipped when already aligned
    # (pre-pad weights at init time to avoid them entirely).
    x2d = x.reshape(N, dim)
    if n_p != N or dim_p != dim:
        x2d = jnp.pad(x2d, ((0, n_p - N), (0, dim_p - dim)))
    if dim_p != dim or hidden_p != hidden:
        w1 = jnp.pad(w1, ((0, dim_p - dim), (0, hidden_p - hidden)))
    if hidden_p != hidden:
        b1 = jnp.pad(b1, ((0, 0), (0, hidden_p - hidden)))
    if hidden_p != hidden or dim_p != dim:
        w2 = jnp.pad(w2, ((0, hidden_p - hidden), (0, dim_p - dim)))
    if dim_p != dim:
        b2 = jnp.pad(b2, ((0, 0), (0, dim_p - dim)))

    cost = pl.CostEstimate(
        flops=4 * N * dim * hidden,
        transcendentals=N * hidden,
        bytes_accessed=(2 * N * dim + 2 * dim * hidden + hidden + dim) * dsize,
    )

    out_shape = jax.ShapeDtypeStruct((n_p, dim_p), x.dtype)

    if n_h == 1:
        # Weight-resident path: weights/biases grid-invariant, no accumulator scratch.
        out2d = pl.pallas_call(
            functools.partial(_ffn_kernel_resident, gelu_approximate),
            out_shape=out_shape,
            grid_spec=pltpu.PrefetchScalarGridSpec(
                num_scalar_prefetch=0,
                grid=(grid_i,),
                in_specs=[
                    pl.BlockSpec((tm, dim_p), lambda i: (i, 0)),        # x row tile
                    pl.BlockSpec((dim_p, hidden_p), lambda i: (0, 0)),  # w1 (resident)
                    pl.BlockSpec((1, hidden_p), lambda i: (0, 0)),      # b1 (resident)
                    pl.BlockSpec((hidden_p, dim_p), lambda i: (0, 0)),  # w2 (resident)
                    pl.BlockSpec((1, dim_p), lambda i: (0, 0)),         # b2 (resident)
                ],
                out_specs=pl.BlockSpec((tm, dim_p), lambda i: (i, 0)),
            ),
            compiler_params=pltpu.CompilerParams(
                dimension_semantics=("parallel",),
                vmem_limit_bytes=vmem_limit,
            ),
            cost_estimate=cost,
        )(x2d, w1, b1, w2, b2)
    else:
        # Chunked path: hidden axis is the reduction ("arbitrary", last in grid).
        out2d = pl.pallas_call(
            functools.partial(_ffn_kernel_chunked, gelu_approximate),
            out_shape=out_shape,
            grid_spec=pltpu.PrefetchScalarGridSpec(
                num_scalar_prefetch=0,
                grid=(grid_i, n_h),
                in_specs=[
                    pl.BlockSpec((tm, dim_p), lambda i, j: (i, 0)),   # x row tile
                    pl.BlockSpec((dim_p, th), lambda i, j: (0, j)),   # w1 hidden chunk
                    pl.BlockSpec((1, th), lambda i, j: (0, j)),       # b1 hidden chunk
                    pl.BlockSpec((th, dim_p), lambda i, j: (j, 0)),   # w2 hidden chunk
                    pl.BlockSpec((1, dim_p), lambda i, j: (0, 0)),    # b2 (resident)
                ],
                out_specs=pl.BlockSpec((tm, dim_p), lambda i, j: (i, 0)),
                scratch_shapes=[pltpu.VMEM((tm, dim_p), jnp.float32)],
            ),
            compiler_params=pltpu.CompilerParams(
                dimension_semantics=("parallel", "arbitrary"),
                vmem_limit_bytes=vmem_limit,
            ),
            cost_estimate=cost,
        )(x2d, w1, b1, w2, b2)

    if n_p != N or dim_p != dim:
        out2d = out2d[:N, :dim]
    return out2d.reshape(B, S, dim)


def _reference(x2d, w1, b1, w2, b2):
    h = x2d @ w1 + b1.reshape(1, -1)
    h = 0.5 * h * (1.0 + lax.erf(h * 0.7071067811865476))
    return h @ w2 + b2.reshape(1, -1)


def _make_params(key, dim, hidden, dtype=jnp.float32):
    k_w1, k_b1, k_w2, k_b2 = jax.random.split(key, 4)
    bound1 = 1.0 / jnp.sqrt(dim)
    bound2 = 1.0 / jnp.sqrt(hidden)
    w1 = jax.random.uniform(k_w1, (dim, hidden), dtype, -bound1, bound1)
    b1 = jax.random.uniform(k_b1, (hidden,), dtype, -bound1, bound1)
    w2 = jax.random.uniform(k_w2, (hidden, dim), dtype, -bound2, bound2)
    b2 = jax.random.uniform(k_b2, (dim,), dtype, -bound2, bound2)
    return w1, b1, w2, b2


if __name__ == "__main__":
    key = jax.random.PRNGKey(0)

    # --- Small test (module-scale toy shapes; exercises padding + resident path) ----
    B, S, dim, hidden = 2, 8, 32, 64
    k_x, k_p = jax.random.split(key)
    x = jax.random.normal(k_x, (B, S, dim), dtype=jnp.float32)
    w1, b1, w2, b2 = _make_params(k_p, dim, hidden)

    out = jax.block_until_ready(feed_forward(x, w1, b1, w2, b2))
    ref = _reference(x.reshape(-1, dim), w1, b1, w2, b2).reshape(B, S, dim)
    assert out.shape == (B, S, dim)
    assert jnp.allclose(out, ref, atol=1e-5, rtol=1e-5), "small-shape mismatch vs reference"

    # --- Aligned multi-row-tile test (no padding; weight-resident, >=2 row tiles) ----
    B2, S2, dim2, hidden2 = 2, 320, 128, 1024
    k_x2, k_p2 = jax.random.split(jax.random.PRNGKey(1))
    x2 = jax.random.normal(k_x2, (B2, S2, dim2), dtype=jnp.float32)
    w1b, b1b, w2b, b2b = _make_params(k_p2, dim2, hidden2)

    out2 = jax.block_until_ready(feed_forward(x2, w1b, b1b, w2b, b2b))
    ref2 = _reference(x2.reshape(-1, dim2), w1b, b1b, w2b, b2b).reshape(B2, S2, dim2)
    assert out2.shape == (B2, S2, dim2)
    assert jnp.allclose(out2, ref2, atol=1e-4, rtol=1e-4), "resident-path mismatch vs reference"

    # --- Chunked-path test (tiny VMEM budget forces hidden-chunk accumulator) -------
    out3 = jax.block_until_ready(
        feed_forward(x2, w1b, b1b, w2b, b2b, vmem_budget_bytes=2 * 1024 * 1024))
    assert jnp.allclose(out3, ref2, atol=1e-4, rtol=1e-4), "chunked-path mismatch vs reference"

    print("KERNEL_OK")
</pallas_src>

<mosaic_0001>
module attributes {stable_mosaic.version = 11 : i64} {
  func.func @_ffn_kernel_resident(%arg0: i32, %arg1: memref<8x128xf32, #tpu.memory_space<vmem>>, %arg2: memref<128x128xf32, #tpu.memory_space<vmem>>, %arg3: memref<1x128xf32, #tpu.memory_space<vmem>>, %arg4: memref<128x128xf32, #tpu.memory_space<vmem>>, %arg5: memref<1x128xf32, #tpu.memory_space<vmem>>, %arg6: memref<8x128xf32, #tpu.memory_space<vmem>>) attributes {dimension_semantics = [#tpu.dimension_semantics<parallel>], iteration_bounds = array<i64: 2>, scalar_prefetch = 0 : i64, scratch_operands = 0 : i64, tpu.core_type = #tpu.core_type<tc>, window_params = [{transform_indices = @transform_0, window_bounds = array<i64: 8, 128>}, {pipeline_mode = #tpu.pipeline_mode<synchronous>, transform_indices = @transform_1, window_bounds = array<i64: 128, 128>}, {pipeline_mode = #tpu.pipeline_mode<synchronous>, transform_indices = @transform_2, window_bounds = array<i64: 1, 128>}, {pipeline_mode = #tpu.pipeline_mode<synchronous>, transform_indices = @transform_3, window_bounds = array<i64: 128, 128>}, {pipeline_mode = #tpu.pipeline_mode<synchronous>, transform_indices = @transform_4, window_bounds = array<i64: 1, 128>}, {transform_indices = @transform_5, window_bounds = array<i64: 8, 128>}]} {
    %c0 = arith.constant 0 : index
    %c0_0 = arith.constant 0 : index
    %0 = vector.load %arg1[%c0, %c0_0] : memref<8x128xf32, #tpu.memory_space<vmem>>, vector<8x128xf32>
    %c0_1 = arith.constant 0 : index
    %c0_2 = arith.constant 0 : index
    %1 = vector.load %arg2[%c0_1, %c0_2] : memref<128x128xf32, #tpu.memory_space<vmem>>, vector<128x128xf32>
    %cst = arith.constant dense<0.000000e+00> : vector<8x128xf32>
    %2 = tpu.matmul %0, %1, %cst {dimension_numbers = #tpu.dot_dimension_numbers<[1], [0], [0], [1], [0, 0, 1, 1], [], []>} : vector<8x128xf32>, vector<128x128xf32>, vector<8x128xf32> -> vector<8x128xf32>
    %c0_3 = arith.constant 0 : index
    %c0_4 = arith.constant 0 : index
    %3 = vector.load %arg3[%c0_3, %c0_4] : memref<1x128xf32, #tpu.memory_space<vmem>>, vector<1x128xf32>
    %4 = vector.broadcast %3 : vector<1x128xf32> to vector<8x128xf32>
    %5 = arith.addf %2, %4 : vector<8x128xf32>
    %cst_5 = arith.constant 5.000000e-01 : f32
    %6 = vector.broadcast %cst_5 : f32 to vector<8x128xf32>
    %7 = arith.mulf %6, %5 : vector<8x128xf32>
    %cst_6 = arith.constant 0.707106769 : f32
    %8 = vector.broadcast %cst_6 : f32 to vector<8x128xf32>
    %9 = arith.mulf %5, %8 : vector<8x128xf32>
    %10 = math.erf %9 : vector<8x128xf32>
    %cst_7 = arith.constant 1.000000e+00 : f32
    %11 = vector.broadcast %cst_7 : f32 to vector<8x128xf32>
    %12 = arith.addf %11, %10 : vector<8x128xf32>
    %13 = arith.mulf %7, %12 : vector<8x128xf32>
    %c0_8 = arith.constant 0 : index
    %c0_9 = arith.constant 0 : index
    %14 = vector.load %arg4[%c0_8, %c0_9] : memref<128x128xf32, #tpu.memory_space<vmem>>, vector<128x128xf32>
    %cst_10 = arith.constant dense<0.000000e+00> : vector<8x128xf32>
    %15 = tpu.matmul %13, %14, %cst_10 {dimension_numbers = #tpu.dot_dimension_numbers<[1], [0], [0], [1], [0, 0, 1, 1], [], []>} : vector<8x128xf32>, vector<128x128xf32>, vector<8x128xf32> -> vector<8x128xf32>
    %c0_11 = arith.constant 0 : index
    %c0_12 = arith.constant 0 : index
    %16 = vector.load %arg5[%c0_11, %c0_12] : memref<1x128xf32, #tpu.memory_space<vmem>>, vector<1x128xf32>
    %17 = vector.broadcast %16 : vector<1x128xf32> to vector<8x128xf32>
    %18 = arith.addf %15, %17 : vector<8x128xf32>
    %c0_13 = arith.constant 0 : index
    %c0_14 = arith.constant 0 : index
    %19 = vector.load %arg6[%c0_13, %c0_14] : memref<8x128xf32, #tpu.memory_space<vmem>>, vector<8x128xf32>
    tpu.vector_store %arg6[%c0_13, %c0_14], %18 {strides = array<i32>} : memref<8x128xf32, #tpu.memory_space<vmem>>, vector<8x128xf32>,
    return
  }
  func.func @transform_0(%arg0: i32) -> (i32, i32) {
    %c0_i32 = arith.constant 0 : i32
    %c0_i32_0 = arith.constant 0 : i32
    return %arg0, %c0_i32 : i32, i32
  }
  func.func @transform_1(%arg0: i32) -> (i32, i32) {
    %c0_i32 = arith.constant 0 : i32
    %c0_i32_0 = arith.constant 0 : i32
    %c0_i32_1 = arith.constant 0 : i32
    return %c0_i32, %c0_i32_0 : i32, i32
  }
  func.func @transform_2(%arg0: i32) -> (i32, i32) {
    %c0_i32 = arith.constant 0 : i32
    %c0_i32_0 = arith.constant 0 : i32
    %c0_i32_1 = arith.constant 0 : i32
    return %c0_i32, %c0_i32_0 : i32, i32
  }
  func.func @transform_3(%arg0: i32) -> (i32, i32) {
    %c0_i32 = arith.constant 0 : i32
    %c0_i32_0 = arith.constant 0 : i32
    %c0_i32_1 = arith.constant 0 : i32
    return %c0_i32, %c0_i32_0 : i32, i32
  }
  func.func @transform_4(%arg0: i32) -> (i32, i32) {
    %c0_i32 = arith.constant 0 : i32
    %c0_i32_0 = arith.constant 0 : i32
    %c0_i32_1 = arith.constant 0 : i32
    return %c0_i32, %c0_i32_0 : i32, i32
  }
  func.func @transform_5(%arg0: i32) -> (i32, i32) {
    %c0_i32 = arith.constant 0 : i32
    %c0_i32_0 = arith.constant 0 : i32
    return %arg0, %c0_i32 : i32, i32
  }
}

</mosaic_0001>

<bundles_post_ra>
// kernel: feed_forward.1
= control target key start
LH: loop header
LB: loop body
LE: loop exit
PB: predicated region body
PF: predicated region fallthrough
CT: control target
= control target key end

     0   :  { %s459_s18 = smov 0   ;;  %s585_s0 = inlined_call_operand.vmem [shape: f32[16,128], index: 0, kind: input, shape index: {}]   ;;  %s586_s1 = inlined_call_operand.vmem [shape: f32[128,128], index: 1, kind: input, shape index: {}]   ;;  %s587_s2 = inlined_call_operand.vmem [shape: f32[1,128], index: 2, kind: input, shape index: {}]   ;;  %s588_s3 = inlined_call_operand.vmem [shape: f32[128,128], index: 3, kind: input, shape index: {}]   ;;  %s589_s4 = inlined_call_operand.vmem [shape: f32[1,128], index: 4, kind: input, shape index: {}]   ;;  %s590_s5 = inlined_call_operand.vmem [shape: f32[16,128], index: 5, kind: output, shape index: {}]  }
   0x1 LB: > { %s399_s19 = sadd.s32 4294967295, %s427_s18   ;;  %p403_p0 = scmp.ge.s32.totalorder %s427_s18, 1  ;;  %s427_s18 = sphi %s459_s18, %s15_s18  }
   0x2   : > { %p186_p1 = scmp.lt.s32.totalorder %s427_s18, 3 }
   0x4   : > { %p187_p2 = pnand %p403_p0, %p186_p1 }
   0x5   : > { %p212_p3 = scmp.lt.s32.totalorder (!%p187_p2), %s399_s19, 1 }
   0x6   : > { %190 = sbr.rel (%p187_p2) target bundleno = 351 (0x15f), region = 40 }
   0xb   : > { %v236_v0 = vld [vmem:[%s586_s1 + $0x78] sm:$0xff]  ;;  %v235_v1 = vld [vmem:[%s586_s1 + $0x70] sm:$0xff]  ;;  %v234_v2 = vld [vmem:[%s586_s1 + $0x68] sm:$0xff]  ;;  %s592_s19 = smov (!%p212_p3, %s399_s19), 1 }
   0xc   : > { %241 = vmatpush.msra.mxu0 %v236_v0  ;;  %v233_v3 = vld [vmem:[%s586_s1 + $0x60] sm:$0xff]  ;;  %v232_v4 = vld [vmem:[%s586_s1 + $0x58] sm:$0xff]  ;;  %v231_v5 = vld [vmem:[%s586_s1 + $0x50] sm:$0xff]  ;;  %s404_s23 = sshll.u32 %s592_s19, 3 }
   0xd   : > { %v230_v6 = vld [vmem:[%s586_s1 + $0x48] sm:$0xff]  ;;  %v229_v7 = vld [vmem:[%s586_s1 + $0x40] sm:$0xff]  ;;  %v228_v8 = vld [vmem:[%s586_s1 + $0x38] sm:$0xff]  ;;  %s215_s30 = scalar_lea.vmem %s585_s0, %s404_s23  ;;  %s219_s27 = scalar_lea.vmem %s590_s5, %s404_s23 }
   0xe   : > { %242 = vmatpush.msra.mxu0 %v235_v1  ;;  %v227_v9 = vld [vmem:[%s586_s1 + $0x30] sm:$0xff]  ;;  %v226_v10 = vld [vmem:[%s586_s1 + $0x28] sm:$0xff]  ;;  %v225_v11 = vld [vmem:[%s586_s1 + $0x20] sm:$0xff] }
   0xf   : > { %v224_v12 = vld [vmem:[%s586_s1 + $0x18] sm:$0xff]  ;;  %v223_v13 = vld [vmem:[%s586_s1 + $0x10] sm:$0xff]  ;;  %v222_v14 = vld [vmem:[%s586_s1 + $0x8] sm:$0xff] }
  0x10   : > { %243 = vmatpush.msra.mxu0 %v234_v2  ;;  %v221_v15 = vld [vmem:[%s586_s1] sm:$0xff]  ;;  %v320_v17 = vld [vmem:[%s588_s3 + $0x78] sm:$0xff]  ;;  %v319_v18 = vld [vmem:[%s588_s3 + $0x70] sm:$0xff] }
  0x11   : > { %v220_v16 = vld [vmem:[%s215_s30] sm:$0xff]  ;;  %325 = vmatpush.msra.mxu1 %v320_v17  ;;  %v318_v19 = vld [vmem:[%s588_s3 + $0x68] sm:$0xff]  ;;  %v316_v22 = vld [vmem:[%s588_s3 + $0x58] sm:$0xff] }
  0x12   : > { %244 = vmatpush.msra.mxu0 %v233_v3  ;;  %v317_v20 = vld [vmem:[%s588_s3 + $0x60] sm:$0xff]  ;;  %v315_v23 = vld [vmem:[%s588_s3 + $0x50] sm:$0xff]  ;;  %v314_v25 = vld [vmem:[%s588_s3 + $0x48] sm:$0xff] }
  0x13   : > { %326 = vmatpush.msra.mxu1 %v319_v18  ;;  %v417_v21 = vld [vmem:[%s587_s2] ss:$0 sm:$0xff]  ;;  %v312_v29 = vld [vmem:[%s588_s3 + $0x38] sm:$0xff]  ;;  %v311_v31 = vld [vmem:[%s588_s3 + $0x30] sm:$0xff] }
  0x14   : > { %245 = vmatpush.msra.mxu0 %v232_v4  ;;  %v313_v27 = vld [vmem:[%s588_s3 + $0x40] sm:$0xff]  ;;  %v310_v33 = vld [vmem:[%s588_s3 + $0x28] sm:$0xff]  ;;  %v308_v39 = vld [vmem:[%s588_s3 + $0x18] sm:$0xff] }
  0x15   : > { %327 = vmatpush.msra.mxu1 %v318_v19  ;;  %v309_v36 = vld [vmem:[%s588_s3 + $0x20] sm:$0xff]  ;;  %v307_v42 = vld [vmem:[%s588_s3 + $0x10] sm:$0xff]  ;;  %v306_v45 = vld [vmem:[%s588_s3 + $0x8] sm:$0xff] }
  0x16   : > { %246 = vmatpush.msra.mxu0 %v231_v5  ;;  %v305_v47 = vld [vmem:[%s588_s3] sm:$0xff] }
  0x17   : > { %328 = vmatpush.msra.mxu1 %v317_v20 }
  0x18   : > { %247 = vmatpush.msra.mxu0 %v230_v6 }
  0x19   : > { %329 = vmatpush.msra.mxu1 %v316_v22 }
  0x1a   : > { %248 = vmatpush.msra.mxu0 %v229_v7 }
  0x1b   : > { %330 = vmatpush.msra.mxu1 %v315_v23 }
  0x1c   : > { %249 = vmatpush.msra.mxu0 %v228_v8 }
  0x1d   : > { %331 = vmatpush.msra.mxu1 %v314_v25 }
  0x1e   : > { %250 = vmatpush.msra.mxu0 %v227_v9 }
  0x1f   : > { %332 = vmatpush.msra.mxu1 %v313_v27 }
  0x20   : > { %251 = vmatpush.msra.mxu0 %v226_v10 }
  0x21   : > { %333 = vmatpush.msra.mxu1 %v312_v29 }
  0x22   : > { %252 = vmatpush.msra.mxu0 %v225_v11  ;;  %v418_v11 = vld [vmem:[%s589_s4] ss:$0 sm:$0xff] }
  0x23   : > { %334 = vmatpush.msra.mxu1 %v311_v31 }
  0x24   : > { %253 = vmatpush.msra.mxu0 %v224_v12 }
  0x25   : > { %335 = vmatpush.msra.mxu1 %v310_v33 }
  0x26   : > { %254 = vmatpush.msra.mxu0 %v223_v13 }
  0x27   : > { %336 = vmatpush.msra.mxu1 %v309_v36 }
  0x28   : > { %255 = vmatpush.msra.mxu0 %v222_v14 }
  0x29   : > { %337 = vmatpush.msra.mxu1 %v308_v39 }
  0x2a   : > { %256 = vmatpush.msra.mxu0 %v221_v15 }
  0x2b   : > { %257 = vmatmul.f32.vlgmr.msra.gmra.mxu0 %v220_v16  ;;  %338 = vmatpush.msra.mxu1 %v307_v42 }
  0x2d   : > { %339 = vmatpush.msra.mxu1 %v306_v45 }
  0x2f   : > { %340 = vmatpush.msra.mxu1 %v305_v47 }
  0xa8   : > { %v258_v24 = vpop.f32.mrf.mxu0 }
  0xa9   : > { %v259_v26 = vadd.f32 %v417_v21, %v258_v24 }
  0xab   : > { %v262_v28 = vmul.f32 0.70710677, %v259_v26  ;;  %v261_v8 = vmul.f32 0.5, %v259_v26 }
  0xad   : > { %v263_v30 = vmul.f32 %v262_v28, %v262_v28 }
  0xaf   : > { %v264_v32 = vmin.f32 %v263_v30, 16.0 }
  0xb1   : > { %v265_v34 = vmul.f32 2.1237322e-06, %v264_v32  ;;  %v276_v35 = vmul.f32 3.8918573e-05, %v264_v32 }
  0xb3   : > { %v266_v37 = vadd.f32 0.00028619796, %v265_v34  ;;  %v277_v38 = vadd.f32 0.001143296, %v276_v35 }
  0xb5   : > { %v267_v40 = vmul.f32 %v266_v37, %v264_v32  ;;  %v278_v41 = vmul.f32 %v277_v38, %v264_v32 }
  0xb7   : > { %v279_v43 = vadd.f32 0.014752088, %v278_v41  ;;  %v268_v44 = vadd.f32 0.0036580483, %v267_v40 }
  0xb9   : > { %v280_v46 = vmul.f32 %v279_v43, %v264_v32  ;;  %v269_v49 = vmul.f32 %v268_v44, %v264_v32 }
  0xbb   : > { %v281_v48 = vadd.f32 0.112945676, %v280_v46  ;;  %v270_v52 = vadd.f32 0.05243302, %v269_v49 }
  0xbd   : > { %v282_v50 = vmul.f32 %v281_v48, %v264_v32  ;;  %v271_v55 = vmul.f32 %v270_v52, %v264_v32 }
  0xbf   : > { %v283_v51 = vadd.f32 0.4994258, %v282_v50  ;;  %v272_v56 = vadd.f32 0.18741608, %v271_v55 }
  0xc1   : > { %v284_v53 = vmul.f32 %v283_v51, %v264_v32  ;;  %v273_v58 = vmul.f32 %v272_v56, %v264_v32 }
  0xc3   : > { %v285_v54 = vadd.f32 1.0, %v284_v53  ;;  %v274_v62 = vadd.f32 1.1283791, %v273_v58 }
  0xc5   : > { %419 = vrcp.f32 %v285_v54  ;;  %v297_v61 = vand.u32 2147483648, %v285_v54  ;;  %v295_v0 = vand.u32 2147483647, %v285_v54  ;;  %vm291_vm1 = vweird.f32 %v285_v54 }
  0xc6   : > { %v275_v3 = vmul.f32 %v274_v62, %v262_v28 }
  0xc7   : > { %v298_v2 = vor.u32 1.1754944e-38, %v297_v61  ;;  %vm296_vm3 = vcmp.eq.f32.partialorder %v295_v0, 8.507059e+37 }
  0xcb   : > { %v420_v57 = vpop.eup %419 }
  0xcc   : > { %v287_v59 = vmul.f32 %v420_v57, %v285_v54  ;;  %vm292_vm0 = vweird.f32 %v420_v57 }
  0xcd   : > { %vm293_vm2 = vmor %vm291_vm1, %vm292_vm0 }
  0xce   : > { %v288_v60 = vsub.f32 1.0, %v287_v59 }
  0xd0   : > { %v289_v63 = vmul.f32 %v420_v57, %v288_v60 }
  0xd2   : > { %v290_v1 = vadd.f32 %v420_v57, %v289_v63 }
  0xd4   : > { %v294_v4 = vsel %vm293_vm2, %v420_v57, %v290_v1 }
  0xd5   : > { %v299_v5 = vsel %vm296_vm3, %v298_v2, %v294_v4 }
  0xd6   : > { %v300_v6 = vmul.f32 %v299_v5, %v275_v3 }
  0xd8   : > { %v406_v7 = vclamps-f32 %v300_v6, 1.0 }
  0xda   : > { %v303_v9 = vadd.f32 1.0, %v406_v7 }
  0xdc   : > { %v304_v10 = vmul.f32 %v303_v9, %v261_v8 }
  0xde   : > { %341 = vmatmul.f32.vlgmr.msra.gmra.mxu1 %v304_v10 }
 0x15b   : > { %v342_v12 = vpop.f32.mrf.mxu1 }
 0x15c   : > { %v343_v13 = vadd.f32 %v418_v11, %v342_v12 }
 0x15e   : > { %345 = vst [vmem:[%s219_s27] sm:$0xff] %v343_v13 }
 0x15f PF: > { %s15_s18 = sadd.s32 1, %s427_s18  }
 0x160   : > { %p12_p4 = scmp.ge.s32.totalorder %s15_s18, 4  }
 0x162   :  { %14 = sbr.rel (!%p12_p4) target bundleno = 1 (0x1), region = 70 }

</bundles_post_ra>
